<compile_context>
chip_gen: v7x
topology: tpu7x:2x2x1
jax: 0.10.0
libtpu: 0.0.40
codegen_flags: <defaults>
</compile_context>

<pallas_src>
import jax
import jax.numpy as jnp
import numpy as np
from jax.experimental import pallas as pl
from jax.experimental.pallas import tpu as pltpu

LEAKY_SLOPE = 0.1
BN_EPS = 1e-5
LANE = 128
VMEM_LIMIT = 64 * 1024 * 1024


def _round_up(n, m):
    return ((n + m - 1) // m) * m


def _pad_last(x, target):
    pad = target - x.shape[-1]
    if pad == 0:
        return x
    return jnp.pad(x, [(0, 0)] * (x.ndim - 1) + [(0, pad)])


def _bn_scale_shift(bn, cpad=None):
    scale = bn['gamma'] / jnp.sqrt(bn['var'] + BN_EPS)
    shift = bn['beta'] - bn['mean'] * scale
    scale = scale.reshape(1, -1)
    shift = shift.reshape(1, -1)
    if cpad is not None:
        scale = _pad_last(scale, cpad)   # padded channels -> activation exactly 0
        shift = _pad_last(shift, cpad)
    return scale, shift


def _prep_conv3_w(w, cout_pad, cin_pad=None):
    """torch (Cout,Cin,3,3,3) -> (27*cin_pad, cout_pad) bf16, tap-major rows
    (row = ((kd*3+kh)*3+kw)*cin_pad + ci) matching the in-kernel patch order."""
    co, ci = w.shape[0], w.shape[1]
    if cin_pad is None:
        cin_pad = ci
    wm = jnp.transpose(w, (2, 3, 4, 1, 0))                    # (kd,kh,kw,ci,co)
    wm = jnp.pad(wm, ((0, 0), (0, 0), (0, 0),
                      (0, cin_pad - ci), (0, cout_pad - co)))
    return wm.reshape(27 * cin_pad, cout_pad).astype(jnp.bfloat16)


# ----------------------------------------------------------------------------
# Kernel 1: MaxPool3d(2) + concat + BN1 + LReLU (haloed bf16) + raw x1
# ----------------------------------------------------------------------------
def _pool_concat_kernel(x_ref, y_ref, s_ref, t_ref, a_ref, x1_ref):
    # x_ref: (1,2,H,W,cx) f32   y_ref: (1,1,Hp,Wp,cy) f32
    _, _, H, W, cx = x_ref.shape
    Hp, Wp = H // 2, W // 2
    v = x_ref[0]
    v = jnp.maximum(v[0], v[1])                       # pool depth pair
    v = v.reshape(Hp, 2, W, cx)
    v = jnp.maximum(v[:, 0], v[:, 1])                 # pool H
    v = v.reshape(Hp, Wp, 2, cx)
    v = jnp.maximum(v[:, :, 0], v[:, :, 1])           # pool W
    x1 = jnp.concatenate([v, y_ref[0, 0]], axis=-1)   # (Hp, Wp, c1)
    x1_ref[0, 0] = x1                                 # raw x1 (residual path)
    a = x1 * s_ref[...] + t_ref[...]                  # folded BN1 (inference)
    a = jnp.maximum(a, LEAKY_SLOPE * a)               # LeakyReLU
    # zero H/W halo written here once == the conv's zero padding of the
    # post-activation tensor; single full store of the haloed tile.
    a_ref[0, 0] = jnp.pad(a.astype(jnp.bfloat16), ((1, 1), (1, 1), (0, 0)))


def _pool_concat_pallas(xcl, ycl, s1, t1):
    N, D, H, W, cx = xcl.shape
    _, Dp, Hp, Wp, cy = ycl.shape
    c1 = cx + cy
    return pl.pallas_call(
        _pool_concat_kernel,
        out_shape=(jax.ShapeDtypeStruct((N, Dp, Hp + 2, Wp + 2, c1), jnp.bfloat16),
                   jax.ShapeDtypeStruct((N, Dp, Hp, Wp, c1), jnp.float32)),
        grid=(N, Dp),
        in_specs=[pl.BlockSpec((1, 2, H, W, cx), lambda n, d: (n, d, 0, 0, 0)),
                  pl.BlockSpec((1, 1, Hp, Wp, cy), lambda n, d: (n, d, 0, 0, 0)),
                  pl.BlockSpec((1, c1), lambda n, d: (0, 0)),
                  pl.BlockSpec((1, c1), lambda n, d: (0, 0))],
        out_specs=(pl.BlockSpec((1, 1, Hp + 2, Wp + 2, c1),
                                lambda n, d: (n, d, 0, 0, 0)),
                   pl.BlockSpec((1, 1, Hp, Wp, c1),
                                lambda n, d: (n, d, 0, 0, 0))),
        compiler_params=pltpu.CompilerParams(
            dimension_semantics=("parallel", "parallel"),
            vmem_limit_bytes=VMEM_LIMIT),
    )(xcl, ycl, s1, t1)


# ----------------------------------------------------------------------------
# Kernels 2/3: 3x3x3 conv (padding=1) with a rolling 3-plane VMEM ring.
# Grid (N, Dp+1): step d inserts activated plane d (already H/W-haloed bf16)
# into the ring and computes output plane d-1 as ONE dot with K = 27*cin
# against a resident flattened weight.  Depth zero-padding = zeroed ring slots.
# Epilogues: "act" (bias+BN2+LReLU, haloed bf16 out), "skip" (x1 residual),
#            "bridge" (BN_b+LReLU+1x1-conv residual).
# ----------------------------------------------------------------------------
def _make_conv_kernel(epilogue, Hp, Wp, cin, coutp, c1):
    def kernel(*refs):
        if epilogue == "act":
            a_ref, w_ref, b_ref, s_ref, t_ref, o_ref, win_ref = refs
        elif epilogue == "skip":
            a_ref, w_ref, b_ref, x1_ref, o_ref, win_ref = refs
        else:  # bridge
            (a_ref, w_ref, b_ref, x1_ref,
             sb_ref, tb_ref, wb_ref, bb_ref, o_ref, win_ref) = refs

        d = pl.program_id(1)
        n_real = pl.num_programs(1) - 1           # = Dp real depth planes

        @pl.when(d == 0)                          # zero plane "-1" + unused slots
        def _():
            win_ref[...] = jnp.zeros_like(win_ref)

        # Insert the freshly delivered plane d into ring slot d%3.
        # The final grid step (d == Dp) provides the trailing depth zero-pad.
        newp = a_ref[0, 0] * (d < n_real).astype(jnp.bfloat16)
        win_ref[d % 3] = newp

        @pl.when(d > 0)                           # full 3-plane window available
        def _():
            pieces = []
            for k in range(3):                    # depth tap -> plane d-2+k
                plane = win_ref[(d + k + 1) % 3]  # == (d-2+k) mod 3
                for kh in range(3):
                    for kw in range(3):
                        pieces.append(plane[kh:kh + Hp, kw:kw + Wp, :])
            patch = jnp.concatenate(pieces, axis=-1).reshape(Hp * Wp, 27 * cin)
            acc = jnp.dot(patch, w_ref[...],
                          preferred_element_type=jnp.float32) + b_ref[...]

            if epilogue == "act":
                a2 = acc * s_ref[...] + t_ref[...]
                a2 = jnp.maximum(a2, LEAKY_SLOPE * a2).astype(jnp.bfloat16)
                o_ref[0, 0] = jnp.pad(a2.reshape(Hp, Wp, coutp),
                                      ((1, 1), (1, 1), (0, 0)))
            elif epilogue == "skip":
                res = jnp.pad(x1_ref[0, 0], ((0, 0), (0, 0), (0, coutp - c1)))
                o_ref[0, 0] = acc.reshape(Hp, Wp, coutp) + res   # single store
            else:  # bridge: one_conv(x1) + x2
                r = x1_ref[0, 0] * sb_ref[...] + tb_ref[...]
                r = jnp.maximum(r, LEAKY_SLOPE * r)
                r = r.astype(jnp.bfloat16).reshape(Hp * Wp, c1)
                acc = acc + jnp.dot(r, wb_ref[...],
                                    preferred_element_type=jnp.float32) + bb_ref[...]
                o_ref[0, 0] = acc.reshape(Hp, Wp, coutp)
    return kernel


def _conv3d_pallas(a, w, b, *, epilogue, bn=None, x1=None, bridge=None):
    """a: (N, Dp, Hp+2, Wp+2, cin) bf16 haloed post-activation; w: (27*cin, coutp)."""
    N, Dp, Hp2, Wp2, cin = a.shape
    Hp, Wp = Hp2 - 2, Wp2 - 2
    coutp = w.shape[-1]
    assert w.shape[0] == 27 * cin
    c1 = x1.shape[-1] if x1 is not None else None

    a_map = lambda n, d: (n, jnp.minimum(d, Dp - 1), 0, 0, 0)
    o_map = lambda n, d: (n, jnp.maximum(d - 1, 0), 0, 0, 0)
    const2 = lambda n, d: (0, 0)

    in_specs = [pl.BlockSpec((1, 1, Hp2, Wp2, cin), a_map),
                pl.BlockSpec((27 * cin, coutp), const2),     # resident weights
                pl.BlockSpec((1, coutp), const2)]
    args = [a, w, b]
    if epilogue == "act":
        s2, t2 = bn
        in_specs += [pl.BlockSpec((1, coutp), const2),
                     pl.BlockSpec((1, coutp), const2)]
        args += [s2, t2]
        out_shape = jax.ShapeDtypeStruct((N, Dp, Hp2, Wp2, coutp), jnp.bfloat16)
        out_spec = pl.BlockSpec((1, 1, Hp2, Wp2, coutp), o_map)
    else:
        in_specs.append(pl.BlockSpec((1, 1, Hp, Wp, c1), o_map))
        args.append(x1)
        if epilogue == "bridge":
            sb, tb, wb, bb = bridge
            in_specs += [pl.BlockSpec((1, c1), const2),
                         pl.BlockSpec((1, c1), const2),
                         pl.BlockSpec((c1, coutp), const2),
                         pl.BlockSpec((1, coutp), const2)]
            args += [sb, tb, wb, bb]
        out_shape = jax.ShapeDtypeStruct((N, Dp, Hp, Wp, coutp), jnp.float32)
        out_spec = pl.BlockSpec((1, 1, Hp, Wp, coutp), o_map)

    flops = 2 * N * Dp * Hp * Wp * 27 * cin * coutp
    bytes_accessed = int(a.size * 2 + w.size * 2
                         + np.prod(out_shape.shape) * jnp.dtype(out_shape.dtype).itemsize)

    return pl.pallas_call(
        _make_conv_kernel(epilogue, Hp, Wp, cin, coutp, c1),
        out_shape=out_shape,
        grid=(N, Dp + 1),
        in_specs=in_specs,
        out_specs=out_spec,
        scratch_shapes=[pltpu.VMEM((3, Hp2, Wp2, cin), jnp.bfloat16)],
        compiler_params=pltpu.CompilerParams(
            dimension_semantics=("parallel", "arbitrary"),
            vmem_limit_bytes=VMEM_LIMIT),
        cost_estimate=pl.CostEstimate(flops=flops, transcendentals=0,
                                      bytes_accessed=bytes_accessed),
    )(*args)


# ----------------------------------------------------------------------------
# full forward (Pallas path)
# ----------------------------------------------------------------------------
def down_forward(x, y, params):
    """x: (N, Cx, D, H, W), y: (N, Cy, D/2, H/2, W/2)  -- NCDHW float32."""
    N, Cx, D, H, W = x.shape
    _, Cy, Dp, Hp, Wp = y.shape
    assert D % 2 == 0 and H % 2 == 0 and W % 2 == 0, "even spatial dims required"
    assert (Dp, Hp, Wp) == (D // 2, H // 2, W // 2)
    c1 = Cx + Cy
    out_ch = params['conv1_w'].shape[0]
    coutp = _round_up(out_ch, LANE)              # lane-dense conv outputs

    xcl = jnp.transpose(x, (0, 2, 3, 4, 1))      # (N, D, H, W, Cx)
    ycl = jnp.transpose(y, (0, 2, 3, 4, 1))      # (N, Dp, Hp, Wp, Cy)

    # 1) pool + concat + BN1 + LReLU  -> a1 (haloed bf16), x1 (raw f32)
    s1, t1 = _bn_scale_shift(params['bn1'])
    a1, x1 = _pool_concat_pallas(xcl, ycl, s1, t1)

    # 2) conv1 + bias + BN2 + LReLU -> a2 (haloed bf16, channels padded to coutp)
    w1 = _prep_conv3_w(params['conv1_w'], coutp)
    b1 = _pad_last(params['conv1_b'].reshape(1, -1), coutp)
    s2, t2 = _bn_scale_shift(params['bn2'], cpad=coutp)
    a2 = _conv3d_pallas(a1, w1, b1, epilogue="act", bn=(s2, t2))

    # 3) conv2 + bias + residual epilogue
    w2 = _prep_conv3_w(params['conv2_w'], coutp, cin_pad=coutp)
    b2 = _pad_last(params['conv2_b'].reshape(1, -1), coutp)
    if c1 == out_ch:
        out_p = _conv3d_pallas(a2, w2, b2, epilogue="skip", x1=x1)
    else:
        sb, tb = _bn_scale_shift(params['bnb'])
        wb = jnp.transpose(params['convb_w'].reshape(out_ch, c1), (1, 0))
        wb = _pad_last(wb, coutp).astype(jnp.bfloat16)           # (c1, coutp)
        bb = _pad_last(params['convb_b'].reshape(1, -1), coutp)
        out_p = _conv3d_pallas(a2, w2, b2, epilogue="bridge",
                               x1=x1, bridge=(sb, tb, wb, bb))

    out = out_p[..., :out_ch]                                    # drop pad lanes
    return jnp.transpose(out, (0, 4, 1, 2, 3))                   # back to NCDHW


# ----------------------------------------------------------------------------
# deterministic parameter init & pure-JAX reference (for verification)
# ----------------------------------------------------------------------------
def init_params(key, in_ch, out_ch):
    ks = jax.random.split(key, 9)

    def bn(k, c):
        k0, k1, k2, k3 = jax.random.split(k, 4)
        return dict(
            gamma=jax.random.uniform(k0, (c,), jnp.float32, 0.5, 1.5),
            beta=0.1 * jax.random.normal(k1, (c,), jnp.float32),
            mean=0.1 * jax.random.normal(k2, (c,), jnp.float32),
            var=jax.random.uniform(k3, (c,), jnp.float32, 0.5, 1.5),
        )

    return dict(
        bn1=bn(ks[0], in_ch),
        conv1_w=0.05 * jax.random.normal(ks[1], (out_ch, in_ch, 3, 3, 3), jnp.float32),
        conv1_b=0.05 * jax.random.normal(ks[2], (out_ch,), jnp.float32),
        bn2=bn(ks[3], out_ch),
        conv2_w=0.05 * jax.random.normal(ks[4], (out_ch, out_ch, 3, 3, 3), jnp.float32),
        conv2_b=0.05 * jax.random.normal(ks[5], (out_ch,), jnp.float32),
        bnb=bn(ks[6], in_ch),
        convb_w=0.05 * jax.random.normal(ks[7], (out_ch, in_ch, 1, 1, 1), jnp.float32),
        convb_b=0.05 * jax.random.normal(ks[8], (out_ch,), jnp.float32),
    )


def _bn_lrelu_ref(x, bn):
    s = bn['gamma'] / jnp.sqrt(bn['var'] + BN_EPS)
    y = (x - bn['mean'][None, :, None, None, None]) * s[None, :, None, None, None] \
        + bn['beta'][None, :, None, None, None]
    return jnp.where(y >= 0, y, LEAKY_SLOPE * y)


def _conv3d_ref(x, w, b, pad):
    out = jax.lax.conv_general_dilated(
        x, w, window_strides=(1, 1, 1), padding=[(pad, pad)] * 3,
        dimension_numbers=('NCDHW', 'OIDHW', 'NCDHW'),
        precision=jax.lax.Precision.HIGHEST)
    return out + b[None, :, None, None, None]


def down_ref(x, y, params):
    xp = jax.lax.reduce_window(x, -jnp.inf, jax.lax.max,
                               (1, 1, 2, 2, 2), (1, 1, 2, 2, 2), 'VALID')
    x1 = jnp.concatenate([xp, y], axis=1)
    in_ch = x1.shape[1]
    a1 = _bn_lrelu_ref(x1, params['bn1'])
    h1 = _conv3d_ref(a1, params['conv1_w'], params['conv1_b'], 1)
    a2 = _bn_lrelu_ref(h1, params['bn2'])
    x2 = _conv3d_ref(a2, params['conv2_w'], params['conv2_b'], 1)
    out_ch = x2.shape[1]
    if in_ch == out_ch:
        return x1 + x2
    ab = _bn_lrelu_ref(x1, params['bnb'])
    br = _conv3d_ref(ab, params['convb_w'], params['convb_b'], 0)
    return br + x2


# ----------------------------------------------------------------------------
if __name__ == "__main__":
    key = jax.random.PRNGKey(0)
    kx, ky, kp1, kp2 = jax.random.split(key, 4)

    N, Cx, D, H, W = 2, 8, 8, 8, 8
    Cy = 8
    x = jax.random.normal(kx, (N, Cx, D, H, W), jnp.float32)
    y = jax.random.normal(ky, (N, Cy, D // 2, H // 2, W // 2), jnp.float32)

    # bf16 MXU inputs with f32 accumulation; reference stays full f32 HIGHEST.
    RTOL, ATOL = 2e-2, 4e-2

    # config A: in_ch=16, out_ch=32  -> shapes differ -> bridge branch
    p_a = init_params(kp1, Cx + Cy, 32)
    out_a = jax.block_until_ready(down_forward(x, y, p_a))
    ref_a = jax.block_until_ready(down_ref(x, y, p_a))
    np.testing.assert_allclose(np.asarray(out_a), np.asarray(ref_a),
                               rtol=RTOL, atol=ATOL)

    # config B: in_ch == out_ch == 16 -> shapes equal -> x_1 + x_2 branch
    p_b = init_params(kp2, Cx + Cy, Cx + Cy)
    out_b = jax.block_until_ready(down_forward(x, y, p_b))
    ref_b = jax.block_until_ready(down_ref(x, y, p_b))
    np.testing.assert_allclose(np.asarray(out_b), np.asarray(ref_b),
                               rtol=RTOL, atol=ATOL)

    print("KERNEL_OK")
</pallas_src>

<mosaic_0001>
module attributes {stable_mosaic.version = 11 : i64} {
  func.func @_pool_concat_kernel(%arg0: i32, %arg1: i32, %arg2: memref<1x2x8x8x8xf32, #tpu.memory_space<vmem>>, %arg3: memref<1x1x4x4x8xf32, #tpu.memory_space<vmem>>, %arg4: memref<1x16xf32, #tpu.memory_space<vmem>>, %arg5: memref<1x16xf32, #tpu.memory_space<vmem>>, %arg6: memref<1x1x6x6x16xbf16, #tpu.memory_space<vmem>>, %arg7: memref<1x1x4x4x16xf32, #tpu.memory_space<vmem>>) attributes {dimension_semantics = [#tpu.dimension_semantics<parallel>, #tpu.dimension_semantics<parallel>], iteration_bounds = array<i64: 2, 4>, scalar_prefetch = 0 : i64, scratch_operands = 0 : i64, tpu.core_type = #tpu.core_type<tc>, window_params = [{transform_indices = @transform_0, window_bounds = array<i64: 1, 2, 8, 8, 8>}, {transform_indices = @transform_1, window_bounds = array<i64: 1, 1, 4, 4, 8>}, {pipeline_mode = #tpu.pipeline_mode<synchronous>, transform_indices = @transform_2, window_bounds = array<i64: 1, 16>}, {pipeline_mode = #tpu.pipeline_mode<synchronous>, transform_indices = @transform_3, window_bounds = array<i64: 1, 16>}, {transform_indices = @transform_4, window_bounds = array<i64: 1, 1, 6, 6, 16>}, {transform_indices = @transform_5, window_bounds = array<i64: 1, 1, 4, 4, 16>}]} {
    %c0 = arith.constant 0 : index
    %c0_0 = arith.constant 0 : index
    %c0_1 = arith.constant 0 : index
    %c0_2 = arith.constant 0 : index
    %c0_3 = arith.constant 0 : index
    %0 = vector.load %arg2[%c0, %c0_0, %c0_1, %c0_2, %c0_3] : memref<1x2x8x8x8xf32, #tpu.memory_space<vmem>>, vector<1x2x8x8x8xf32>
    %1 = vector.shape_cast %0 : vector<1x2x8x8x8xf32> to vector<2x8x8x8xf32>
    %2 = vector.extract_strided_slice %1 {offsets = [0, 0, 0, 0], sizes = [1, 8, 8, 8], strides = [1, 1, 1, 1]} : vector<2x8x8x8xf32> to vector<1x8x8x8xf32>
    %3 = vector.shape_cast %2 : vector<1x8x8x8xf32> to vector<8x8x8xf32>
    %4 = vector.extract_strided_slice %1 {offsets = [1, 0, 0, 0], sizes = [1, 8, 8, 8], strides = [1, 1, 1, 1]} : vector<2x8x8x8xf32> to vector<1x8x8x8xf32>
    %5 = vector.shape_cast %4 : vector<1x8x8x8xf32> to vector<8x8x8xf32>
    %6 = arith.maximumf %3, %5 : vector<8x8x8xf32>
    %7 = vector.shape_cast %6 : vector<8x8x8xf32> to vector<4x2x8x8xf32>
    %8 = vector.extract_strided_slice %7 {offsets = [0, 0, 0, 0], sizes = [4, 1, 8, 8], strides = [1, 1, 1, 1]} : vector<4x2x8x8xf32> to vector<4x1x8x8xf32>
    %9 = vector.shape_cast %8 : vector<4x1x8x8xf32> to vector<4x8x8xf32>
    %10 = vector.extract_strided_slice %7 {offsets = [0, 1, 0, 0], sizes = [4, 1, 8, 8], strides = [1, 1, 1, 1]} : vector<4x2x8x8xf32> to vector<4x1x8x8xf32>
    %11 = vector.shape_cast %10 : vector<4x1x8x8xf32> to vector<4x8x8xf32>
    %12 = arith.maximumf %9, %11 : vector<4x8x8xf32>
    %13 = vector.shape_cast %12 : vector<4x8x8xf32> to vector<4x4x2x8xf32>
    %14 = vector.extract_strided_slice %13 {offsets = [0, 0, 0, 0], sizes = [4, 4, 1, 8], strides = [1, 1, 1, 1]} : vector<4x4x2x8xf32> to vector<4x4x1x8xf32>
    %15 = vector.shape_cast %14 : vector<4x4x1x8xf32> to vector<4x4x8xf32>
    %16 = vector.extract_strided_slice %13 {offsets = [0, 0, 1, 0], sizes = [4, 4, 1, 8], strides = [1, 1, 1, 1]} : vector<4x4x2x8xf32> to vector<4x4x1x8xf32>
    %17 = vector.shape_cast %16 : vector<4x4x1x8xf32> to vector<4x4x8xf32>
    %18 = arith.maximumf %15, %17 : vector<4x4x8xf32>
    %c0_4 = arith.constant 0 : index
    %c0_5 = arith.constant 0 : index
    %c0_6 = arith.constant 0 : index
    %c0_7 = arith.constant 0 : index
    %c0_8 = arith.constant 0 : index
    %19 = vector.load %arg3[%c0_4, %c0_5, %c0_6, %c0_7, %c0_8] : memref<1x1x4x4x8xf32, #tpu.memory_space<vmem>>, vector<1x1x4x4x8xf32>
    %20 = vector.shape_cast %19 : vector<1x1x4x4x8xf32> to vector<4x4x8xf32>
    %21 = tpu.concatenate %18, %20 in 2 : vector<4x4x8xf32>, vector<4x4x8xf32> -> vector<4x4x16xf32>
    %c0_9 = arith.constant 0 : index
    %c0_10 = arith.constant 0 : index
    %c0_11 = arith.constant 0 : index
    %c0_12 = arith.constant 0 : index
    %c0_13 = arith.constant 0 : index
    %22 = vector.load %arg7[%c0_9, %c0_10, %c0_11, %c0_12, %c0_13] : memref<1x1x4x4x16xf32, #tpu.memory_space<vmem>>, vector<1x1x4x4x16xf32>
    %23 = vector.shape_cast %22 : vector<1x1x4x4x16xf32> to vector<4x4x16xf32>
    %24 = vector.shape_cast %21 : vector<4x4x16xf32> to vector<1x1x4x4x16xf32>
    tpu.vector_store %arg7[%c0_9, %c0_10, %c0_11, %c0_12, %c0_13], %24 {strides = array<i32>} : memref<1x1x4x4x16xf32, #tpu.memory_space<vmem>>, vector<1x1x4x4x16xf32>,
    %c0_14 = arith.constant 0 : index
    %c0_15 = arith.constant 0 : index
    %25 = vector.load %arg4[%c0_14, %c0_15] : memref<1x16xf32, #tpu.memory_space<vmem>>, vector<1x16xf32>
    %26 = vector.shape_cast %25 : vector<1x16xf32> to vector<1x1x16xf32>
    %27 = vector.broadcast %26 : vector<1x1x16xf32> to vector<4x4x16xf32>
    %28 = arith.mulf %21, %27 : vector<4x4x16xf32>
    %c0_16 = arith.constant 0 : index
    %c0_17 = arith.constant 0 : index
    %29 = vector.load %arg5[%c0_16, %c0_17] : memref<1x16xf32, #tpu.memory_space<vmem>>, vector<1x16xf32>
    %30 = vector.shape_cast %29 : vector<1x16xf32> to vector<1x1x16xf32>
    %31 = vector.broadcast %30 : vector<1x1x16xf32> to vector<4x4x16xf32>
    %32 = arith.addf %28, %31 : vector<4x4x16xf32>
    %cst = arith.constant 1.000000e-01 : f32
    %33 = vector.broadcast %cst : f32 to vector<4x4x16xf32>
    %34 = arith.mulf %33, %32 : vector<4x4x16xf32>
    %35 = arith.maximumf %32, %34 : vector<4x4x16xf32>
    %36 = arith.truncf %35 : vector<4x4x16xf32> to vector<4x4x16xbf16>
    %c0_i32 = arith.constant 0 : i32
    %37 = arith.sitofp %c0_i32 : i32 to bf16
    %38 = vector.broadcast %37 : bf16 to vector<1x4x16xbf16>
    %39 = tpu.concatenate %38, %36 in 0 : vector<1x4x16xbf16>, vector<4x4x16xbf16> -> vector<5x4x16xbf16>
    %40 = vector.broadcast %37 : bf16 to vector<1x4x16xbf16>
    %41 = tpu.concatenate %39, %40 in 0 : vector<5x4x16xbf16>, vector<1x4x16xbf16> -> vector<6x4x16xbf16>
    %42 = vector.broadcast %37 : bf16 to vector<6x1x16xbf16>
    %43 = tpu.concatenate %42, %41 in 1 : vector<6x1x16xbf16>, vector<6x4x16xbf16> -> vector<6x5x16xbf16>
    %44 = vector.broadcast %37 : bf16 to vector<6x1x16xbf16>
    %45 = tpu.concatenate %43, %44 in 1 : vector<6x5x16xbf16>, vector<6x1x16xbf16> -> vector<6x6x16xbf16>
    %c0_18 = arith.constant 0 : index
    %c0_19 = arith.constant 0 : index
    %c0_20 = arith.constant 0 : index
    %c0_21 = arith.constant 0 : index
    %c0_22 = arith.constant 0 : index
    %46 = vector.load %arg6[%c0_18, %c0_19, %c0_20, %c0_21, %c0_22] : memref<1x1x6x6x16xbf16, #tpu.memory_space<vmem>>, vector<1x1x6x6x16xbf16>
    %47 = vector.shape_cast %46 : vector<1x1x6x6x16xbf16> to vector<6x6x16xbf16>
    %48 = vector.shape_cast %45 : vector<6x6x16xbf16> to vector<1x1x6x6x16xbf16>
    tpu.vector_store %arg6[%c0_18, %c0_19, %c0_20, %c0_21, %c0_22], %48 {strides = array<i32>} : memref<1x1x6x6x16xbf16, #tpu.memory_space<vmem>>, vector<1x1x6x6x16xbf16>,
    return
  }
  func.func @transform_0(%arg0: i32, %arg1: i32) -> (i32, i32, i32, i32, i32) {
    %c0_i32 = arith.constant 0 : i32
    %c0_i32_0 = arith.constant 0 : i32
    %c0_i32_1 = arith.constant 0 : i32
    %c0_i32_2 = arith.constant 0 : i32
    return %arg0, %arg1, %c0_i32, %c0_i32_0, %c0_i32_1 : i32, i32, i32, i32, i32
  }
  func.func @transform_1(%arg0: i32, %arg1: i32) -> (i32, i32, i32, i32, i32) {
    %c0_i32 = arith.constant 0 : i32
    %c0_i32_0 = arith.constant 0 : i32
    %c0_i32_1 = arith.constant 0 : i32
    %c0_i32_2 = arith.constant 0 : i32
    return %arg0, %arg1, %c0_i32, %c0_i32_0, %c0_i32_1 : i32, i32, i32, i32, i32
  }
  func.func @transform_2(%arg0: i32, %arg1: i32) -> (i32, i32) {
    %c0_i32 = arith.constant 0 : i32
    %c0_i32_0 = arith.constant 0 : i32
    %c0_i32_1 = arith.constant 0 : i32
    return %c0_i32, %c0_i32_0 : i32, i32
  }
  func.func @transform_3(%arg0: i32, %arg1: i32) -> (i32, i32) {
    %c0_i32 = arith.constant 0 : i32
    %c0_i32_0 = arith.constant 0 : i32
    %c0_i32_1 = arith.constant 0 : i32
    return %c0_i32, %c0_i32_0 : i32, i32
  }
  func.func @transform_4(%arg0: i32, %arg1: i32) -> (i32, i32, i32, i32, i32) {
    %c0_i32 = arith.constant 0 : i32
    %c0_i32_0 = arith.constant 0 : i32
    %c0_i32_1 = arith.constant 0 : i32
    %c0_i32_2 = arith.constant 0 : i32
    return %arg0, %arg1, %c0_i32, %c0_i32_0, %c0_i32_1 : i32, i32, i32, i32, i32
  }
  func.func @transform_5(%arg0: i32, %arg1: i32) -> (i32, i32, i32, i32, i32) {
    %c0_i32 = arith.constant 0 : i32
    %c0_i32_0 = arith.constant 0 : i32
    %c0_i32_1 = arith.constant 0 : i32
    %c0_i32_2 = arith.constant 0 : i32
    return %arg0, %arg1, %c0_i32, %c0_i32_0, %c0_i32_1 : i32, i32, i32, i32, i32
  }
}

</mosaic_0001>

<bundles_post_ra>
// kernel: tpu_custom_call.1
= control target key start
LH: loop header
LB: loop body
LE: loop exit
PB: predicated region body
PF: predicated region fallthrough
CT: control target
= control target key end

     0   :  { %s1900_s0 = inlined_call_operand.hbm [shape: f32[2,8,8,8,8], index: 0, kind: input, shape index: {}]   ;;  %s1901_s1 = inlined_call_operand.hbm [shape: f32[2,4,4,4,8], index: 1, kind: input, shape index: {}]   ;;  %s1902_s2 = inlined_call_operand.hbm [shape: f32[1,16], index: 2, kind: input, shape index: {}]   ;;  %s1903_s3 = inlined_call_operand.hbm [shape: f32[1,16], index: 3, kind: input, shape index: {}]   ;;  %s1904_s4 = inlined_call_operand.hbm [shape: bf16[2,4,6,6,16], index: 4, kind: output, shape index: {0}]   ;;  %s1905_s5 = inlined_call_operand.hbm [shape: f32[2,4,4,4,16], index: 5, kind: output, shape index: {1}]  }
   0x1   :  { %1916 = sst [smem:[#allocation24_spill]] %s1900_s0 }
   0x2   :  { %1917 = sst [smem:[#allocation25_spill]] %s1902_s2 }
   0x3   :  { %1918 = sst [smem:[#allocation26_spill]] %s1903_s3 }
   0x4   :  { %1919 = sst [smem:[#allocation27_spill]] %s1904_s4 }
   0x5   :  { %11 = vsyncpa [#allocation3], 0 }
   0x6   :  { %13 = vsyncpa [#allocation3 + $0x1], 0 }
   0x7   :  { %14 = vsyncpa [#allocation6], 0 }
   0x8   :  { %16 = vsyncpa [#allocation6 + $0x1], 0 }
   0x9   :  { %17 = vsyncpa [#allocation9], 0 }
   0xa   :  { %18 = vsyncpa [#allocation4], 0 }
   0xb   :  { %20 = vsyncpa [#allocation4 + $0x1], 0 }
   0xc   :  { %21 = vsyncpa [#allocation12], 0 }
   0xd   :  { %23 = vsyncpa [#allocation12 + $0x1], 0  ;;  %s1434_s18 = smov 0   ;;  %s1436_s19 = smov 0  }
   0xe   :  { %s1438_s20 = smov 0   ;;  %s1440_s21 = smov 0  }
   0xf   :  { %s1442_s22 = smov 0   ;;  %s1444_s23 = smov 0  }
  0x10   :  { %s1446_s24 = smov 0   ;;  %s1448_s25 = smov 0  }
  0x11 LB: > { %1920 = sst [smem:[#allocation19_spill]] %s1359_s18  ;;  %s1475_s26 = sadd.s32 4294967295, %s1387_s25   ;;  %s1387_s25 = sphi %s1448_s25, %s29_s25   ;;  %s1383_s24 = sphi %s1446_s24, %s1962_s24   ;;  %s1379_s23 = sphi %s1444_s23, %s1961_s23   ;;  %s1375_s22 = sphi %s1442_s22, %s1960_s22   ;;  %s1371_s21 = sphi %s1440_s21, %s1959_s21   ;;  %s1367_s20 = sphi %s1438_s20, %s1958_s20   ;;  %s1363_s19 = sphi %s1436_s19, %s1957_s19   ;;  %s1359_s18 = sphi %s1434_s18, %s1956_s18  }
  0x12   : > { %s962_s27 = sadd.s32 4294967294, %s1387_s25   ;;  %p57_p0 = scmp.ne.s32.totalorder %s1367_s20, %s1363_s19 }
  0x13   : > { %p58_p1 = scmp.eq.s32.totalorder %s1387_s25, 0  ;;  %p63_p2 = scmp.ne.s32.totalorder %s1363_s19, %s1359_s18 }
  0x14   : > { %p1906_p3 = scmp.eq.s32.totalorder %s1475_s26, 0  ;;  %p159_p4 = scmp.eq.s32.totalorder %s1475_s26, 7 }
  0x15   : > { %p1486_p5 = por %p58_p1, %p57_p0  ;;  %p165_p6 = scmp.eq.s32.totalorder %s962_s27, 7 }
  0x16   : > { %p1492_p7 = por %p1906_p3, %p63_p2  ;;  %p1496_p8 = por %p159_p4, %p57_p0 }
  0x17   : > { %p1500_p9 = por %p165_p6, %p63_p2  ;;  %p963_p10 = scmp.ge.s32.totalorder %s1387_s25, 1 }
  0x18   : > { %s1922_s30 = scalar_select %p1492_p7, 1, 0 }
  0x19   : > { %s1923_s6 = scalar_select %p1496_p8, 1, 0 }
  0x1a   : > { %s1924_s7 = scalar_select %p1500_p9, 1, 0 }
  0x1b   : > { %p200_p11 = scmp.lt.s32.totalorder %s1387_s25, 9  ;;  %s1389_s9 = smov [#allocation7]  }
  0x1c   : > { %1925 = sst [smem:[#allocation20_spill]] %s1924_s7  ;;  %s213_s10 = sshll.u32 %s1389_s9, 4  ;;  %s214_s10 = int_to_ptr.vmem [resolvable:$true] %s213_s10 }
  0x1d   : > { %p1506_p12 = pnand %p963_p10, %p200_p11  ;;  %p1050_p13 = scmp.lt.s32.totalorder %s1387_s25, 8 }
  0x1e   : > { %s1390_s12 = smov [#allocation8]   ;;  %s1929_s2 = sld [smem:[#allocation25_spill]] }
  0x1f   : > { %s1926_s8 = scalar_select %p1506_p12, 1, 0 }
  0x20   : > { %p1027_p0 = pneg %p1506_p12  ;;  %p1515_p1 = pnand %p1050_p13, %p1486_p5 }
  0x21   : > { %s224_s13 = sshll.u32 %s1390_s12, 4  ;;  %s1525_s13 = int_to_ptr.vmem [resolvable:$true] %s224_s13 }
  0x22   : > { %s1927_s11 = scalar_select %p1515_p1, 1, 0 }
  0x23   : > { %p1521_p2 = pnand %p1027_p0, %p1906_p3 }
  0x24   : > { %s1129_s17 = scalar_lea.hbm %s1929_s2, 16 }
  0x25   : > { %p1130_p4 = scmp.ne.s32.totalorder %s1929_s2, %s1129_s17  ;;  %p1131_p5 = pneg %p1521_p2 }
  0x26   : > { %p1136_p11 = scmp.lt.u32.totalorder %s1129_s17, %s1929_s2 }
  0x27   : > { %p1132_p6 = pnand %p1131_p5, %p1130_p4 }
  0x29   : > { %p1133_p10 = pneg %p1132_p6 }
  0x2b   : > { %p1138_p13 = pnand %p1136_p11, %p1133_p10 }
  0x2d   : > { %1141 = shalt.err (!%p1138_p13)
}
  0x2e   : > { %s1142_s28 = scalar_lea.vmem %s214_s10, 16  ;;  %s1149_s15 = scalar_lea.vmem %s214_s10, 32 }
  0x2f   : > { %p1143_p0 = scmp.ne.s32.totalorder %s214_s10, %s1142_s28  ;;  %p1150_p8 = scmp.lt.s32.totalorder %s214_s10, %s214_s10 }
  0x30   : > { %p1151_p7 = scmp.lt.s32.totalorder %s1149_s15, %s1142_s28 }
  0x31   : > { %p1145_p3 = pnand %p1143_p0, %p1131_p5 }
  0x32   : > { %p1152_p12 = por %p1151_p7, %p1150_p8 }
  0x33   : > { %p1146_p9 = pneg %p1145_p3 }
  0x35   : > { %p1153_p1 = pnand %p1152_p12, %p1146_p9 }
  0x37   : > { %1156 = shalt.err (!%p1153_p1)
}
  0x38   : > { %1030 = dma.hbm_to_vmem [thread:$0]  (!%p1521_p2), %s1929_s2, 16, %s214_s10, [#allocation6]  }
  0x39   : > { %s1930_s3 = sld [smem:[#allocation26_spill]] }
  0x3f   : > { %s1157_s9 = scalar_lea.hbm %s1930_s3, 16 }
  0x40   : > { %p1158_p3 = scmp.ne.s32.totalorder %s1930_s3, %s1157_s9  ;;  %p1164_p9 = scmp.lt.u32.totalorder %s1157_s9, %s1930_s3 }
  0x42   : > { %p1160_p7 = pnand %p1158_p3, %p1131_p5 }
  0x44   : > { %p1161_p8 = pneg %p1160_p7 }
  0x46   : > { %p1166_p12 = pnand %p1164_p9, %p1161_p8 }
  0x48   : > { %1169 = shalt.err (!%p1166_p12)
}
  0x49   : > { %s1170_s10 = scalar_lea.vmem %s1525_s13, 16  ;;  %s1177_s7 = scalar_lea.vmem %s1525_s13, 32 }
  0x4a   : > { %p1171_p1 = scmp.ne.s32.totalorder %s1525_s13, %s1170_s10  ;;  %p1178_p10 = scmp.lt.s32.totalorder %s1525_s13, %s1525_s13 }
  0x4b   : > { %p1179_p11 = scmp.lt.s32.totalorder %s1177_s7, %s1170_s10 }
  0x4c   : > { %p1173_p4 = pnand %p1171_p1, %p1131_p5 }
  0x4d   : > { %p1180_p13 = por %p1179_p11, %p1178_p10 }
  0x4e   : > { %p1174_p6 = pneg %p1173_p4 }
  0x50   : > { %p1181_p0 = pnand %p1180_p13, %p1174_p6 }
  0x52   : > { %1184 = shalt.err (!%p1181_p0)
}
  0x53   : > { %1033 = dma.hbm_to_vmem [thread:$0]  (!%p1521_p2), %s1930_s3, 16, %s1525_s13, [#allocation9]  }
  0x54   : > { %s38_s17 = sadd.s32 1, %s1379_s23  ;;  %s41_s29 = sadd.s32 1, %s1383_s24 }
  0x55   : > { %p39_p5 = scmp.ge.s32.totalorder %s38_s17, 4  ;;  %s1578_s9 = sand.u32 1, %s1367_s20  }
  0x56   : > { %s967_s14 = sshll.u32 %s1578_s9, 7  ;;  %s1007_s28 = sshll.u32 %s1379_s23, 4 }
  0x57   : > { %s1964_s17 = smov (%p39_p5, %s38_s17), 0  ;;  %s1966_s29 = smov (!%p39_p5, %s41_s29), %s1383_s24 }
  0x58   : > { %1931 = sst [smem:[#allocation21_spill]] %s1964_s17  ;;  %s46_s12 = ssub.s32 %s1379_s23, %s1964_s17 }
  0x59   : > { %p43_p3 = scmp.ge.s32.totalorder %s1966_s29, 2  ;;  %s970_s13 = sshll.u32 %s1383_s24, 6 }
  0x5a   : > { %s239_s15 = scalar_lea.vmem [#allocation2], %s967_s14  ;;  %s246_s7 = sadd.s32 %s1007_s28, %s970_s13 }
  0x5b   : > { %s249_s10 = sshll.u32 %s239_s15, 4  ;;  %s1968_s29 = smov (%p43_p3, %s1966_s29), 0  ;;  %s1590_s10 = int_to_ptr.vmem [resolvable:$true] %s249_s10 }
  0x5c   : > { %1932 = sst [smem:[#allocation22_spill]] %s1968_s29  ;;  %s45_s16 = ssub.s32 %s1383_s24, %s1968_s29 }
  0x5d   : > { %s971_s27 = sshll.u32 %s246_s7, 7  ;;  %s47_s2 = sor.u32 %s46_s12, %s45_s16 }
  0x5e   : > { %s1933_s0 = sld [smem:[#allocation24_spill]]  ;;  %p48_p2 = scmp.eq.s32.totalorder %s47_s2, 0 }
  0x5f   : > { %s1934_s15 = sadd.s32 1, %s1367_s20  ;;  %s236_s28 = scalar_lea.sflag [#allocation3], %s1578_s9 }
  0x60   : > { %s1603_s4 = scalar_select %p48_p2, %s1367_s20, %s1934_s15  }
  0x61   : > { %p1936_p8 = scmp.ne.s32.totalorder %s1927_s11, 0 }
  0x62   : > { %1935 = sst [smem:[#allocation23_spill]] %s1603_s4 }
  0x63   : > { %p1187_p9 = pneg %p1936_p8 }
  0x64   : > { %s1597_s17 = scalar_lea.hbm %s1933_s0, %s971_s27  ;;  %s1190_s12 = scalar_lea.hbm %s1933_s0, 16384 }
  0x65   : > { %s1185_s13 = scalar_lea.hbm %s1597_s17, 2048  ;;  %p1191_p4 = scmp.lt.u32.totalorder %s1597_s17, %s1933_s0 }
  0x66   : > { %p1186_p7 = scmp.ne.s32.totalorder %s1597_s17, %s1185_s13  ;;  %p1192_p6 = scmp.lt.u32.totalorder %s1190_s12, %s1185_s13 }
  0x67   : > { %p1194_p11 = scmp.lt.u32.totalorder %s1185_s13, %s1597_s17 }
  0x68   : > { %p1188_p12 = pnand %p1187_p9, %p1186_p7  ;;  %p1193_p10 = por %p1192_p6, %p1191_p4 }
  0x6a   : > { %p1189_p1 = pneg %p1188_p12  ;;  %p1195_p13 = por %p1194_p11, %p1193_p10 }
  0x6c   : > { %p1196_p0 = pnand %p1195_p13, %p1189_p1 }
  0x6e   : > { %1199 = shalt.err (!%p1196_p0)
}
  0x6f   : > { %s1200_s2 = scalar_lea.vmem %s1590_s10, 2048  ;;  %s1391_s27 = smov [#allocation2]  }
  0x70   : > { %p1201_p5 = scmp.ne.s32.totalorder %s1590_s10, %s1200_s2  ;;  %s1205_s15 = sshll.u32 %s1391_s27, 4  ;;  %s1206_s15 = int_to_ptr.vmem [resolvable:$false] %s1205_s15 }
  0x71   : > { %s1207_s3 = scalar_lea.vmem %s1206_s15, 4096  ;;  %p1208_p7 = scmp.lt.s32.totalorder %s1590_s10, %s1206_s15 }
  0x72   : > { %p1203_p3 = pnand %p1201_p5, %p1187_p9  ;;  %p1209_p12 = scmp.lt.s32.totalorder %s1207_s3, %s1200_s2 }
  0x74   : > { %p1204_p2 = pneg %p1203_p3  ;;  %p1210_p4 = por %p1209_p12, %p1208_p7 }
  0x76   : > { %p1211_p6 = pnand %p1210_p4, %p1204_p2 }
  0x78   : > { %1214 = shalt.err (!%p1211_p6)
}
  0x79   : > { %s1392_s13 = smov 128   ;;  %s1393_s18 = smov 8  }
  0x7a   : > { %1037 = dma.hbm_to_vmem [thread:$0]  (!%p1936_p8), %s1597_s17, 2048, %s1590_s10, %s236_s28, %s1392_s13, %s1392_s13, %s1393_s18  }
  0x7b   : > { %s972_s12 = sshll.u32 %s1578_s9, 4  ;;  %s973_s7 = sshll.u32 %s1379_s23, 2 }
  0x7c   : > { %s974_s16 = sshll.u32 %s1383_s24, 4  ;;  %s263_s2 = scalar_lea.vmem [#allocation5], %s972_s12 }
  0x7d   : > { %s272_s27 = sshll.u32 %s263_s2, 4  ;;  %s269_s15 = sadd.s32 %s974_s16, %s973_s7  ;;  %s1636_s27 = int_to_ptr.vmem [resolvable:$true] %s272_s27 }
  0x7e   : > { %s975_s3 = sshll.u32 %s269_s15, 6  ;;  %s1937_s4 = sand.u32 1, %s1387_s25  }
  0x7f   : > { %s1641_s29 = scalar_lea.hbm %s1901_s1, %s975_s3  ;;  %s1645_s17 = scalar_lea.sflag [#allocation6], %s1937_s4 }
  0x80   : > { %s1215_s9 = scalar_lea.hbm %s1641_s29, 256  ;;  %s1220_s13 = scalar_lea.hbm %s1901_s1, 2048 }
  0x81   : > { %p1216_p1 = scmp.ne.s32.totalorder %s1641_s29, %s1215_s9  ;;  %p1221_p13 = scmp.lt.u32.totalorder %s1641_s29, %s1901_s1 }
  0x82   : > { %p1222_p0 = scmp.lt.u32.totalorder %s1220_s13, %s1215_s9  ;;  %p1224_p3 = scmp.lt.u32.totalorder %s1215_s9, %s1641_s29 }
  0x83   : > { %p1218_p10 = pnand %p1216_p1, %p1187_p9 }
  0x84   : > { %p1223_p5 = por %p1222_p0, %p1221_p13 }
  0x85   : > { %p1219_p11 = pneg %p1218_p10 }
  0x86   : > { %p1225_p2 = por %p1224_p3, %p1223_p5 }
  0x88   : > { %p1226_p7 = pnand %p1225_p2, %p1219_p11 }
  0x8a   : > { %1229 = shalt.err (!%p1226_p7)
}
  0x8b   : > { %s1230_s4 = scalar_lea.vmem %s1636_s27, 256  ;;  %s1394_s18 = smov [#allocation5]  }
  0x8c   : > { %p1231_p12 = scmp.ne.s32.totalorder %s1636_s27, %s1230_s4  ;;  %s1235_s12 = sshll.u32 %s1394_s18, 4  ;;  %s1236_s12 = int_to_ptr.vmem [resolvable:$false] %s1235_s12 }
  0x8d   : > { %s1237_s7 = scalar_lea.vmem %s1236_s12, 512  ;;  %p1238_p1 = scmp.lt.s32.totalorder %s1636_s27, %s1236_s12 }
  0x8e   : > { %p1233_p4 = pnand %p1231_p12, %p1187_p9  ;;  %p1239_p10 = scmp.lt.s32.totalorder %s1237_s7, %s1230_s4 }
  0x90   : > { %p1234_p6 = pneg %p1233_p4  ;;  %p1240_p13 = por %p1239_p10, %p1238_p1 }
  0x92   : > { %p1241_p0 = pnand %p1240_p13, %p1234_p6 }
  0x94   : > { %1244 = shalt.err (!%p1241_p0)
}
  0x95   : > { %s1395_s16 = smov 64   ;;  %s1396_s2 = smov 4  }
  0x96   : > { %1040 = dma.hbm_to_vmem [thread:$0]  (!%p1936_p8), %s1641_s29, 256, %s1636_s27, %s1645_s17, %s1395_s16, %s1395_s16, %s1396_s2  }
  0x97   : > { %p1938_p9 = scmp.ne.s32.totalorder %s1926_s8, 0 }
  0x98   : > { %s1674_s15 = sand.u32 (!%p1938_p9), 1, %s1363_s19   ;;  %p1939_p11 = scmp.ne.s32.totalorder (!%p1938_p9), %s1922_s30, 0 }
  0x99   : > { %284 = sbr.rel (%p1938_p9) target bundleno = 338 (0x152), region = 36  ;;  %s977_s3 = sshll.u32 (!%p1938_p9), %s1674_s15, 7 }
  0x9a   : > { %s287_s9 = scalar_lea.sflag (!%p1938_p9), [#allocation3], %s1674_s15  ;;  %s1678_s10 = scalar_lea.vmem (!%p1938_p9), [#allocation2], %s977_s3 }
  0xa0   : > { %1334 = dma.done.wait (%p1939_p11), %s287_s9, 2048  }
  0xa1   : > { %1336 = vsyncadd (%p1939_p11), %s287_s9, 4294965248  ;;  %s295_s8 = sand.u32 1, %s1475_s26   ;;  %s978_s11 = sshll.u32 %s1674_s15, 4 }
  0xa2   : > { %s296_s29 = scalar_lea.sflag [#allocation6], %s295_s8  ;;  %s299_s27 = scalar_lea.vmem [#allocation5], %s978_s11 }
  0xa3   : > { %1338 = dma.done.wait (%p1939_p11), %s296_s29, 256  }
  0xa4   : > { %1340 = vsyncadd (%p1939_p11), %s296_s29, 4294967040  ;;  %p1940_p8 = scmp.eq.s32.totalorder %s1475_s26, 0 }
  0xa6   : > { %1342 = dma.done.wait (%p1940_p8), [#allocation6], 16   ;;  %p1941_p5 = pmov %p1940_p8 }
  0xa8   : > { %1344 = vsyncadd (%p1941_p5), [#allocation6], 4294967280  ;;  %p1942_p3 = pmov %p1941_p5 }
  0xaa   : > { %1346 = dma.done.wait (%p1942_p3), [#allocation9], 16   ;;  %p1943_p2 = pmov %p1942_p3 }
  0xab   : > { %s1008_s17 = smul.u32 24, %s1674_s15  ;;  %v1397_v0 = vmov 0   ;;  %vm729_vm0 = vcmask 1040384   ;;  %vm730_vm1 = vsmask.f32 256  ;;  %vm737_vm3 = vcmask 1042432  }
  0xac   : > { %1348 = vsyncadd (%p1943_p2), [#allocation9], 4294967280  ;;  %v692_v1 = vrot.slane %v1397_v0, 7  ;;  %vm738_vm4 = vsmask.f32 2304  ;;  %vm745_vm6 = vcmask 124928   ;;  %v382_v12 = vlaneseq }
  0xad   : > { %vm1701_vm2 = vmand %vm729_vm0, %vm730_vm1  ;;  %v528_v6 = vld [vmem:[%s299_s27 + $0x8] sm:$0xf]  ;;  %v526_v7 = vld [vmem:[%s299_s27] sm:$0xf]  ;;  %s1713_s26 = scalar_lea.vmem [#allocation10], %s1008_s17  ;;  %s1398_s30 = smov 8  }
  0xae   : > { %v732_v3 = vsel %vm1701_vm2, 0, %v692_v1  ;;  %vm1707_vm5 = vmand %vm737_vm3, %vm738_vm4  ;;  %637 = vrot.lane.b32.xlu1 %v528_v6, %s1398_s30  ;;  %633 = vrot.lane.b32.xlu0 %v526_v7, %s1398_s30  ;;  %v529_v8 = vld [vmem:[%s299_s27 + $0xc] sm:$0xf]  ;;  %v527_v9 = vld [vmem:[%s299_s27 + $0x4] sm:$0xf]  ;;  %v383_v22 = vshrl.u32 %v382_v12, 7 }
  0xaf   : > { %v740_v5 = vsel %vm1707_vm5, %v732_v3, 0  ;;  %v1399_v10 = vmov 1983009808   ;;  %v350_v13 = vld [vmem:[%s1678_s10 + $0x20] sm:$0xff]  ;;  %v351_v14 = vld [vmem:[%s1678_s10 + $0x28] sm:$0xff]  ;;  %v352_v27 = vld [vmem:[%s1678_s10 + $0x30] sm:$0xff] }
  0xb0   : > { %746 = vst.msk [vmem:[%s1713_s26] sm:$0x7] %vm745_vm6, %v740_v5  ;;  %751 = vst.msk [vmem:[%s1713_s26 + $0x14] sm:$0x7] %vm745_vm6, %v740_v5  ;;  %v380_v11 = vunpack.c.l.s4 %v1399_v10  ;;  %v358_v15 = vld [vmem:[%s1678_s10 + $0x60] sm:$0xff]  ;;  %v359_v16 = vld [vmem:[%s1678_s10 + $0x68] sm:$0xff] }
  0xb1   : > { %v346_v17 = vld [vmem:[%s1678_s10] sm:$0xff]  ;;  %v347_v18 = vld [vmem:[%s1678_s10 + $0x8] sm:$0xff]  ;;  %v366_v23 = vmax.f32 %v350_v13, %v358_v15  ;;  %v367_v24 = vmax.f32 %v351_v14, %v359_v16  ;;  %v353_v28 = vld [vmem:[%s1678_s10 + $0x38] sm:$0xff]  ;;  %v1735_v60 = vsub.s32 0, %v383_v22  ;;  %vm610_vm7 = vcmask 1041409   ;;  %s1002_s28 = sshll.u32 %s1371_s21, 2 }
  0xb2   : > { %639 = vrot.lane.b32.xlu1 %v529_v8, %s1398_s30  ;;  %635 = vrot.lane.b32.xlu0 %v527_v9, %s1398_s30  ;;  %v354_v19 = vld [vmem:[%s1678_s10 + $0x40] sm:$0xff]  ;;  %v355_v20 = vld [vmem:[%s1678_s10 + $0x48] sm:$0xff]  ;;  %v381_v21 = vunpack.c.0.s8 %v380_v11  ;;  %vm612_vm8 = vcmask 1042434   ;;  %vm614_vm9 = vcmask 1043459   ;;  %s1003_s13 = sshll.u32 %s1375_s22, 4  ;;  %vm645_vm10 = vcmask 64512  }
  0xb3   : > { %v362_v25 = vmax.f32 %v346_v17, %v354_v19  ;;  %v363_v26 = vmax.f32 %v347_v18, %v355_v20  ;;  %v360_v29 = vld [vmem:[%s1678_s10 + $0x70] sm:$0xff]  ;;  %v361_v30 = vld [vmem:[%s1678_s10 + $0x78] sm:$0xff]  ;;  %v372_v36 = vmax.f32 %v366_v23, %v367_v24  ;;  %s788_s0 = sadd.s32 %s1003_s13, %s1002_s28  ;;  %vm650_vm11 = vcmask 125952   ;;  %s343_s14 = scalar_lea.vmem [#allocation11], %s978_s11 }
  0xb4   : > { %v348_v31 = vld [vmem:[%s1678_s10 + $0x10] sm:$0xff]  ;;  %v349_v32 = vld [vmem:[%s1678_s10 + $0x18] sm:$0xff]  ;;  %v384_v35 = vsub.s32 %v381_v21, %v383_v22  ;;  %v368_v38 = vmax.f32 %v352_v27, %v360_v29  ;;  %v369_v39 = vmax.f32 %v353_v28, %v361_v30  ;;  %s791_s4 = sshll.u32 %s343_s14, 4  ;;  %s1004_s18 = sshll.u32 %s788_s0, 6  ;;  %s1769_s4 = int_to_ptr.vmem [resolvable:$true] %s791_s4 }
  0xb5   : > { %v356_v33 = vld [vmem:[%s1678_s10 + $0x50] sm:$0xff]  ;;  %v357_v34 = vld [vmem:[%s1678_s10 + $0x58] sm:$0xff]  ;;  %v370_v37 = vmax.f32 %v362_v25, %v363_v26  ;;  %v412_v46 = vcombine.high %v372_v36, %v372_v36  ;;  %s1778_s16 = scalar_lea.hbm %s1905_s5, %s1004_s18  ;;  %s758_s2 = scalar_lea.sflag [#allocation12], %s1674_s15 }
  0xb6   : > { %v364_v40 = vmax.f32 %v348_v31, %v356_v33  ;;  %v365_v41 = vmax.f32 %v349_v32, %v357_v34  ;;  %v419_v42 = vrot.slane %v372_v36, %v384_v35  ;;  %v373_v44 = vmax.f32 %v368_v38, %v369_v39  ;;  %s1245_s3 = scalar_lea.vmem %s1769_s4, 256  ;;  %p1948_p12 = scmp.ne.s32.totalorder %s1923_s6, 0 }
  0xb7   : > { %v385_v43 = vrot.slane %v370_v37, %v384_v35  ;;  %v378_v47 = vcombine.high %v370_v37, %v370_v37  ;;  %v426_v52 = vrot.slane %v412_v46, %v384_v35  ;;  %p1246_p7 = scmp.ne.s32.totalorder %s1769_s4, %s1245_s3  ;;  %s1400_s9 = smov [#allocation11]  }
  0xb8   : > { %v371_v45 = vmax.f32 %v364_v40, %v365_v41  ;;  %v427_v48 = vcombine.high %v419_v42, %v419_v42  ;;  %v436_v50 = vrot.slane %v373_v44, %v384_v35  ;;  %v990_v53 = vrot.slane %v419_v42, 9  ;;  %s1249_s10 = sshll.u32 %s1400_s9, 4  ;;  %s1250_s10 = int_to_ptr.vmem [resolvable:$false] %s1249_s10 }
  0xb9   : > { %v393_v49 = vcombine.high %v385_v43, %v385_v43  ;;  %v392_v54 = vrot.slane %v378_v47, %v384_v35  ;;  %v982_v55 = vrot.slane %v385_v43, 9  ;;  %v429_v56 = vcombine.high %v373_v44, %v373_v44  ;;  %p1247_p4 = pnand %p1246_p7, %p1948_p12  ;;  %s1251_s8 = scalar_lea.vmem %s1250_s10, 512 }
  0xba   : > { %v402_v51 = vrot.slane %v371_v45, %v384_v35  ;;  %v395_v57 = vcombine.high %v371_v45, %v371_v45  ;;  %v991_v58 = vrot.slane %v427_v48, 9  ;;  %v444_v61 = vcombine.high %v436_v50, %v436_v50  ;;  %p1252_p1 = scmp.lt.s32.totalorder %s1769_s4, %s1250_s10  ;;  %p1253_p10 = scmp.lt.s32.totalorder %s1251_s8, %s1245_s3 }
  0xbb   : > { %v983_v59 = vrot.slane %v393_v49, 9  ;;  %v428_v63 = vcombine.high %v426_v52, %v426_v52  ;;  %v992_v0 = vrot.slane %v426_v52, 9  ;;  %v518_v1 = vmax.f32 %v419_v42, %v990_v53  ;;  %p1248_p6 = pneg %p1247_p4 }
  0xbc   : > { %v410_v62 = vcombine.high %v402_v51, %v402_v51  ;;  %v394_v3 = vcombine.high %v392_v54, %v392_v54  ;;  %v984_v5 = vrot.slane %v392_v54, 9  ;;  %v510_v6 = vmax.f32 %v385_v43, %v982_v55  ;;  %p1254_p13 = por %p1253_p10, %p1252_p1 }
  0xbd   : > { %v443_v7 = vrot.slane %v429_v56, %v384_v35  ;;  %v409_v8 = vrot.slane %v395_v57, %v384_v35  ;;  %v519_v9 = vmax.f32 %v427_v48, %v991_v58  ;;  %v511_v10 = vmax.f32 %v393_v49, %v983_v59  ;;  %v998_v59 = vld [vmem:[#allocation7] ss:$0 sm:$0xff] }
  0xbe   : > { %v994_v11 = vrot.slane %v436_v50, 9  ;;  %v995_v12 = vrot.slane %v444_v61, 9  ;;  %v986_v13 = vrot.slane %v402_v51, 9  ;;  %v987_v14 = vrot.slane %v410_v62, 9  ;;  %p1255_p0 = pnand %p1254_p13, %p1248_p6 }
  0xbf   : > { %v993_v15 = vrot.slane %v428_v63, 9  ;;  %v520_v16 = vmax.f32 %v426_v52, %v992_v0  ;;  %v581_v17 = vrot.slane %v518_v1, %v1735_v60  ;;  %v985_v18 = vrot.slane %v394_v3, 9  ;;  %v999_v1 = vld [vmem:[#allocation8] ss:$0 sm:$0xff] }
  0xc0   : > { %v512_v19 = vmax.f32 %v392_v54, %v984_v5  ;;  %v549_v20 = vrot.slane %v510_v6, %v1735_v60  ;;  %v445_v21 = vcombine.high %v443_v7, %v443_v7  ;;  %v411_v22 = vcombine.high %v409_v8, %v409_v8 }
  0xc1   : > { %v585_v23 = vrot.slane %v519_v9, %v1735_v60  ;;  %v553_v24 = vrot.slane %v511_v10, %v1735_v60  ;;  %v996_v25 = vrot.slane %v443_v7, 9  ;;  %v988_v26 = vrot.slane %v409_v8, 9 }
  0xc2   : > { %v522_v27 = vmax.f32 %v436_v50, %v994_v11  ;;  %v523_v28 = vmax.f32 %v444_v61, %v995_v12  ;;  %v514_v29 = vmax.f32 %v402_v51, %v986_v13  ;;  %v515_v30 = vmax.f32 %v410_v62, %v987_v14 }
  0xc3   : > { %v521_v31 = vmax.f32 %v428_v63, %v993_v15  ;;  %v589_v32 = vrot.slane %v520_v16, %v1735_v60  ;;  %v513_v33 = vmax.f32 %v394_v3, %v985_v18  ;;  %v557_v34 = vrot.slane %v512_v19, %v1735_v60 }
  0xc4   : > { %v997_v35 = vrot.slane %v445_v21, 9  ;;  %v989_v36 = vrot.slane %v411_v22, 9  ;;  %v619_v37 = vsel %vm610_vm7, %v585_v23, %v581_v17  ;;  %v611_v38 = vsel %vm610_vm7, %v553_v24, %v549_v20 }
  0xc5   : > { %v524_v39 = vmax.f32 %v443_v7, %v996_v25  ;;  %v516_v40 = vmax.f32 %v409_v8, %v988_v26  ;;  %v597_v41 = vrot.slane %v522_v27, %v1735_v60  ;;  %v601_v42 = vrot.slane %v523_v28, %v1735_v60 }
  0xc6   : > { %v565_v43 = vrot.slane %v514_v29, %v1735_v60  ;;  %v569_v44 = vrot.slane %v515_v30, %v1735_v60  ;;  %v593_v45 = vrot.slane %v521_v31, %v1735_v60  ;;  %v561_v46 = vrot.slane %v513_v33, %v1735_v60 }
  0xc7   : > { %v525_v47 = vmax.f32 %v445_v21, %v997_v35  ;;  %v517_v48 = vmax.f32 %v411_v22, %v989_v36  ;;  %v620_v49 = vsel %vm612_vm8, %v589_v32, %v619_v37  ;;  %v613_v50 = vsel %vm612_vm8, %v557_v34, %v611_v38 }
  0xc8   : > { %v605_v51 = vrot.slane %v524_v39, %v1735_v60  ;;  %v573_v52 = vrot.slane %v516_v40, %v1735_v60  ;;  %v622_v53 = vsel %vm610_vm7, %v601_v42, %v597_v41  ;;  %v616_v54 = vsel %vm610_vm7, %v569_v44, %v565_v43 }
  0xc9   : > { %v621_v55 = vsel %vm614_vm9, %v593_v45, %v620_v49  ;;  %v615_v56 = vsel %vm614_vm9, %v561_v46, %v613_v50  ;;  %v609_v57 = vrot.slane %v525_v47, %v1735_v60  ;;  %v577_v58 = vrot.slane %v517_v48, %v1735_v60 }
  0xca   : > { %v623_v61 = vsel %vm612_vm8, %v605_v51, %v622_v53  ;;  %v617_v62 = vsel %vm612_vm8, %v573_v52, %v616_v54 }
  0xcb   : > { %v624_v7 = vsel %vm614_vm9, %v609_v57, %v623_v61  ;;  %v618_v8 = vsel %vm614_vm9, %v577_v58, %v617_v62 }
 0x120   : > { %v638_v63 = vpop.permute.xlu1 %637  ;;  %v634_v0 = vpop.permute.xlu0 %633 }
 0x121   : > { %v648_v3 = vsel %vm645_vm10, %v621_v55, %v638_v63  ;;  %v646_v5 = vsel %vm645_vm10, %v615_v56, %v634_v0 }
 0x122   : > { %653 = vst.msk [vmem:[%s343_s14 + $0x8] sm:$0xf] %vm650_vm11, %v648_v3  ;;  %v664_v60 = vmul.f32 %v998_v59, %v648_v3  ;;  %651 = vst.msk [vmem:[%s343_s14] sm:$0xf] %vm650_vm11, %v646_v5  ;;  %v662_v6 = vmul.f32 %v998_v59, %v646_v5 }
 0x124   : > { %v675_v9 = vadd.f32 %v999_v1, %v664_v60  ;;  %v673_v10 = vadd.f32 %v999_v1, %v662_v6  ;;  %v640_v11 = vpop.permute.xlu1 %639  ;;  %v636_v12 = vpop.permute.xlu0 %635 }
 0x125   : > { %v649_v13 = vsel %vm645_vm10, %v624_v7, %v640_v11  ;;  %v647_v14 = vsel %vm645_vm10, %v618_v8, %v636_v12 }
 0x126   : > { %v679_v15 = vmul.f32 0.1, %v675_v9  ;;  %v677_v16 = vmul.f32 0.1, %v673_v10  ;;  %654 = vst.msk [vmem:[%s343_s14 + $0xc] sm:$0xf] %vm650_vm11, %v649_v13  ;;  %v665_v17 = vmul.f32 %v998_v59, %v649_v13  ;;  %v663_v18 = vmul.f32 %v998_v59, %v647_v14 }
 0x127   : > { %652 = vst.msk [vmem:[%s343_s14 + $0x4] sm:$0xf] %vm650_vm11, %v647_v14 }
 0x128   : > { %1258 = shalt.err (!%p1255_p0)
}
 0x129   : > { %s1259_s11 = scalar_lea.hbm %s1778_s16, 256  ;;  %s1263_s17 = scalar_lea.hbm %s1905_s5, 2048 }
 0x12a   : > { %p1260_p9 = scmp.ne.s32.totalorder %s1778_s16, %s1259_s11  ;;  %p1264_p5 = scmp.lt.u32.totalorder %s1778_s16, %s1905_s5 }
 0x12b   : > { %p1265_p3 = scmp.lt.u32.totalorder %s1263_s17, %s1259_s11  ;;  %p1267_p7 = scmp.lt.u32.totalorder %s1259_s11, %s1778_s16 }
 0x12c   : > { %p1261_p11 = pnand %p1260_p9, %p1948_p12 }
 0x12d   : > { %p1266_p2 = por %p1265_p3, %p1264_p5 }
 0x12e   : > { %p1262_p8 = pneg %p1261_p11 }
 0x12f   : > { %p1268_p4 = por %p1267_p7, %p1266_p2 }
 0x131   : > { %p1269_p6 = pnand %p1268_p4, %p1262_p8 }
 0x133   : > { %1272 = shalt.err (!%p1269_p6)
}
 0x134   : > { %s1401_s13 = smov 64   ;;  %s1402_s0 = smov 4   ;;  %v683_v19 = vmax.f32 %v675_v9, %v679_v15  ;;  %v681_v20 = vmax.f32 %v673_v10, %v677_v16  ;;  %v676_v21 = vadd.f32 %v999_v1, %v665_v17  ;;  %v674_v22 = vadd.f32 %v999_v1, %v663_v18 }
 0x135   : > { %1024 = dma.vmem_to_hbm [thread:$0]  (%p1948_p12), %s1769_s4, 256, %s1778_s16, %s758_s2, %s1401_s13, %s1401_s13, %s1402_s0  }
 0x136   : > { %v687_v23 = vpack.c.bf16 %v683_v19, %v683_v19  ;;  %v685_v24 = vpack.c.bf16 %v681_v20, %v681_v20  ;;  %v680_v25 = vmul.f32 0.1, %v676_v21  ;;  %v678_v26 = vmul.f32 0.1, %v674_v22  ;;  %s1009_s14 = smul.u32 6, %s1371_s21  ;;  %s1949_s16 = sld [smem:[#allocation27_spill]] }
 0x137   : > { %s1010_s18 = smul.u32 24, %s1375_s22  ;;  %s773_s22 = sshll.u32 %s1713_s26, 4  ;;  %s1835_s22 = int_to_ptr.vmem [resolvable:$true] %s773_s22 }
 0x138   : > { %v711_v27 = vshrl.u32 %v687_v23, 16  ;;  %v697_v28 = vshrl.u32 %v685_v24, 16  ;;  %v684_v29 = vmax.f32 %v676_v21, %v680_v25  ;;  %v682_v30 = vmax.f32 %v674_v22, %v678_v26  ;;  %s753_s3 = scalar_lea.sflag [#allocation4], %s1674_s15  ;;  %s1273_s9 = scalar_lea.vmem %s1835_s22, 384 }
 0x139   : > { %v714_v32 = vshll.u32 %v687_v23, 16  ;;  %v700_v34 = vshll.u32 %v685_v24, 16  ;;  %s770_s4 = sadd.s32 %s1010_s18, %s1009_s14  ;;  %p1274_p1 = scmp.ne.s32.totalorder %s1835_s22, %s1273_s9 }
 0x13a   : > { %v713_v31 = vrot.slane %v711_v27, 7  ;;  %v699_v33 = vrot.slane %v697_v28, 7  ;;  %v688_v35 = vpack.c.bf16 %v684_v29, %v684_v29  ;;  %v686_v36 = vpack.c.bf16 %v682_v30, %v682_v30  ;;  %s1001_s21 = sshll.u32 %s770_s4, 6  ;;  %s1403_s10 = smov [#allocation10]  }
 0x13b   : > { %p1275_p10 = pnand %p1274_p1, %p1948_p12  ;;  %s1277_s8 = sshll.u32 %s1403_s10, 4  ;;  %s1278_s8 = int_to_ptr.vmem [resolvable:$false] %s1277_s8 }
 0x13c   : > { %v716_v37 = vor.u32 %v714_v32, %v713_v31  ;;  %v702_v38 = vor.u32 %v700_v34, %v699_v33  ;;  %v718_v39 = vshrl.u32 %v688_v35, 16  ;;  %v704_v40 = vshrl.u32 %v686_v36, 16  ;;  %s1833_s2 = scalar_lea.hbm %s1949_s16, %s1001_s21  ;;  %s1279_s11 = scalar_lea.vmem %s1278_s8, 768 }
 0x13d   : > { %v721_v43 = vshll.u32 %v688_v35, 16  ;;  %v707_v44 = vshll.u32 %v686_v36, 16  ;;  %p1276_p13 = pneg %p1275_p10  ;;  %p1280_p0 = scmp.lt.s32.totalorder %s1835_s22, %s1278_s8 }
 0x13e   : > { %v735_v41 = vsel %vm1701_vm2, 0, %v716_v37  ;;  %v733_v42 = vsel %vm1701_vm2, 0, %v702_v38  ;;  %v720_v47 = vrot.slane %v718_v39, 7  ;;  %v706_v48 = vrot.slane %v704_v40, 7  ;;  %p1281_p9 = scmp.lt.s32.totalorder %s1279_s11, %s1273_s9 }
 0x13f   : > { %v743_v45 = vsel %vm1707_vm5, %v735_v41, 0  ;;  %v741_v46 = vsel %vm1707_vm5, %v733_v42, 0 }
 0x140   : > { %749 = vst.msk [vmem:[%s1713_s26 + $0xc] sm:$0x7] %vm745_vm6, %v743_v45  ;;  %747 = vst.msk [vmem:[%s1713_s26 + $0x4] sm:$0x7] %vm745_vm6, %v741_v46  ;;  %v723_v49 = vor.u32 %v721_v43, %v720_v47  ;;  %v709_v50 = vor.u32 %v707_v44, %v706_v48  ;;  %p1282_p11 = por %p1281_p9, %p1280_p0 }
 0x142   : > { %v736_v51 = vsel %vm1701_vm2, 0, %v723_v49  ;;  %v734_v52 = vsel %vm1701_vm2, 0, %v709_v50  ;;  %p1283_p8 = pnand %p1282_p11, %p1276_p13 }
 0x143   : > { %v744_v53 = vsel %vm1707_vm5, %v736_v51, 0  ;;  %v742_v54 = vsel %vm1707_vm5, %v734_v52, 0 }
 0x144   : > { %750 = vst.msk [vmem:[%s1713_s26 + $0x10] sm:$0x7] %vm745_vm6, %v744_v53  ;;  %748 = vst.msk [vmem:[%s1713_s26 + $0x8] sm:$0x7] %vm745_vm6, %v742_v54 }
 0x145   : > { %1286 = shalt.err (!%p1283_p8)
}
 0x146   : > { %s1287_s26 = scalar_lea.hbm %s1833_s2, 384  ;;  %s1291_s17 = scalar_lea.hbm %s1949_s16, 3072 }
 0x147   : > { %p1288_p5 = scmp.ne.s32.totalorder %s1833_s2, %s1287_s26  ;;  %p1292_p7 = scmp.lt.u32.totalorder %s1833_s2, %s1949_s16 }
 0x148   : > { %p1293_p4 = scmp.lt.u32.totalorder %s1291_s17, %s1287_s26  ;;  %p1295_p1 = scmp.lt.u32.totalorder %s1287_s26, %s1833_s2 }
 0x149   : > { %p1289_p3 = pnand %p1288_p5, %p1948_p12 }
 0x14a   : > { %p1294_p6 = por %p1293_p4, %p1292_p7 }
 0x14b   : > { %p1290_p2 = pneg %p1289_p3 }
 0x14c   : > { %p1296_p10 = por %p1295_p1, %p1294_p6 }
 0x14e   : > { %p1297_p13 = pnand %p1296_p10, %p1290_p2 }
 0x150   : > { %1300 = shalt.err (!%p1297_p13)
}
 0x151   : > { %1023 = dma.vmem_to_hbm [thread:$0]  (%p1948_p12), %s1835_s22, 384, %s1833_s2, %s753_s3, %s1401_s13, %s1401_s13, %s1402_s0  }
 0x152 PF: > { %s1950_s14 = sld [smem:[#allocation19_spill]]  ;;  %s1951_s18 = sld [smem:[#allocation20_spill]] }
 0x153   : > { %p1053_p0 = scmp.ge.s32.totalorder %s1387_s25, 2 }
 0x158   : > { %s806_s4 = sand.u32 1, %s1950_s14   ;;  %p1952_p9 = scmp.ne.s32.totalorder %s1951_s18, 0 }
 0x159   : > { %s807_s21 = scalar_lea.sflag [#allocation4], %s806_s4 }
 0x15a   : > { %p1042_p11 = pnand %p1053_p0, %p1952_p9 }
 0x15c   : > { %1350 = dma.done.wait (!%p1042_p11), %s807_s21, 384  }
 0x15d   : > { %1352 = vsyncadd (!%p1042_p11), %s807_s21, 4294966912  ;;  %s816_s6 = scalar_lea.sflag [#allocation12], %s806_s4 }
 0x15e   : > { %1354 = dma.done.wait (!%p1042_p11), %s816_s6, 256  }
 0x15f   : > { %1356 = vsyncadd (!%p1042_p11), %s816_s6, 4294967040  ;;  %s29_s25 = sadd.s32 1, %s1387_s25   ;;  %s1953_s15 = sld [smem:[#allocation23_spill]] }
 0x160   : > { %p26_p8 = scmp.ge.s32.totalorder %s29_s25, 10   ;;  %s1954_s13 = sld [smem:[#allocation21_spill]] }
 0x161   : > { %s1955_s0 = sld [smem:[#allocation22_spill]]  ;;  %s1956_s18 = smov %s1363_s19 }
 0x162   : > { %s1957_s19 = smov %s1367_s20  ;;  %s1959_s21 = smov %s1379_s23 }
 0x163   : > { %s1960_s22 = smov %s1383_s24  ;;  %28 = sbr.rel (!%p26_p8) target bundleno = 17 (0x11), region = 119 }
 0x165   : > { %s1958_s20 = smov %s1953_s15 }
 0x166   : > { %s1961_s23 = smov %s1954_s13 }
 0x167   : > { %s1962_s24 = smov %s1955_s0 }
 0x16a   :  { %821 = vsyncpa [#allocation3], 1 }
 0x16b   :  { %823 = vsyncpa [#allocation3 + $0x1], 1 }
 0x16c   :  { %824 = vsyncpa [#allocation6], 1 }
 0x16d   :  { %826 = vsyncpa [#allocation6 + $0x1], 1 }
 0x16e   :  { %827 = vsyncpa [#allocation9], 1 }
 0x16f   :  { %828 = vsyncpa [#allocation4], 1 }
 0x170   :  { %830 = vsyncpa [#allocation4 + $0x1], 1 }
 0x171   :  { %831 = vsyncpa [#allocation12], 1 }
 0x172   :  { %833 = vsyncpa [#allocation12 + $0x1], 1 }

</bundles_post_ra>
